<compile_context>
chip_gen: v6e
topology: v6e:2x2x1
jax: 0.10.0
libtpu: 0.0.40
codegen_flags: <defaults>
</compile_context>

<pallas_src>
from functools import partial

import numpy as np
import jax
import jax.numpy as jnp
from jax.experimental import pallas as pl
from jax.experimental.pallas import tpu as pltpu

_LANES = 128
# 4096 rows x 128 lanes x 4 B = 2 MiB per buffer. Double-buffered in + out
# (4 buffers ~ 8 MiB) fits v5e's 16 MiB default scoped VMEM without flags and
# is comfortably safe on v6e/v7x (32 MiB scoped).
_MAX_BLOCK_ROWS = 4096
# Below this total size, a fused XLA multiply beats any pallas_call launch.
_PALLAS_MIN_BYTES = 1 << 20

_SUBLANE_BY_ITEMSIZE = {4: 8, 2: 16, 1: 32}


def _round_up(x, m):
    return ((x + m - 1) // m) * m


def _min_sublane(dtype):
    return _SUBLANE_BY_ITEMSIZE.get(np.dtype(dtype).itemsize, 8)


# ---------------------------------------------------------------------------
# Pallas kernel: lane-dense streaming multiply by a resident (1, 128) scale row.
# ---------------------------------------------------------------------------
def _scale_kernel(scale_ref, x_ref, o_ref):
    # scale_ref: (1, 128) resident alternating [1/w, 1/h, ...] row (VMEM)
    # x_ref/o_ref: (block_rows, 128) lane-dense slab of the flattened input
    o_ref[...] = x_ref[...] * scale_ref[...]


@jax.jit
def _normalize_pallas_impl(x, scale_row):
    """x: [B, T, D] (D even). scale_row: (1, 128) alternating reciprocals."""
    B, T, D = x.shape
    dtype = x.dtype
    n = B * T * D

    sub = _min_sublane(dtype)
    rows = max(_round_up(pl.cdiv(n, _LANES), sub), sub)
    num_blocks = pl.cdiv(rows, _MAX_BLOCK_ROWS)
    block_rows = _round_up(pl.cdiv(rows, num_blocks), sub)
    rows_padded = num_blocks * block_rows
    n_padded = rows_padded * _LANES

    # Lane-dense flattened view. Even/odd column parity survives flattening
    # because D and 128 are both even, so (flat_idx % D) and the lane index
    # have the same parity.
    flat = x.reshape(-1)
    if n_padded != n:
        flat = jnp.pad(flat, (0, n_padded - n))
    x2d = flat.reshape(rows_padded, _LANES)

    out2d = pl.pallas_call(
        _scale_kernel,
        out_shape=jax.ShapeDtypeStruct((rows_padded, _LANES), dtype),
        grid_spec=pltpu.PrefetchScalarGridSpec(
            num_scalar_prefetch=0,
            grid=(num_blocks,),
            in_specs=[
                pl.BlockSpec((1, _LANES), lambda r: (0, 0)),           # resident scale
                pl.BlockSpec((block_rows, _LANES), lambda r: (r, 0)),  # data slab
            ],
            out_specs=pl.BlockSpec((block_rows, _LANES), lambda r: (r, 0)),
        ),
        compiler_params=pltpu.CompilerParams(
            dimension_semantics=("parallel",),
        ),
    )(scale_row, x2d)

    out = out2d.reshape(-1)
    if n_padded != n:
        out = out[:n]
    return out.reshape(B, T, D)


@jax.jit
def _normalize_xla_impl(x, scale_vec):
    # Tiny-input fallback: one fused broadcast multiply, no kernel launch.
    return x * scale_vec


# ---------------------------------------------------------------------------
# Host-side scale caches (built once per (img_w, img_h, dtype)).
# ---------------------------------------------------------------------------
_scale_row_cache = {}
_scale_vec_cache = {}


def _get_scale_row(img_w, img_h, dtype):
    key = (float(img_w), float(img_h), np.dtype(dtype).name)
    row = _scale_row_cache.get(key)
    if row is None:
        row_np = np.tile(
            np.array([1.0 / float(img_w), 1.0 / float(img_h)], dtype=dtype),
            _LANES // 2,
        ).reshape(1, _LANES)
        row = jnp.asarray(row_np)
        _scale_row_cache[key] = row
    return row


def _get_scale_vec(img_w, img_h, dtype, D):
    key = (float(img_w), float(img_h), np.dtype(dtype).name, int(D))
    vec = _scale_vec_cache.get(key)
    if vec is None:
        vec_np = np.tile(
            np.array([1.0 / float(img_w), 1.0 / float(img_h)], dtype=dtype), D // 2
        )
        vec = jnp.asarray(vec_np)
        _scale_vec_cache[key] = vec
    return vec


def normalize_conditions(cond_encodeds, img_w, img_h, use_pallas=None):
    """cond_encodeds: [B, T, D] with D even. Even cols / img_w, odd cols / img_h."""
    B, T, D = cond_encodeds.shape
    assert D % 2 == 0, "feature dim must be even for lane-dense normalization"
    n = B * T * D
    if n == 0:
        return cond_encodeds

    dtype = cond_encodeds.dtype
    if use_pallas is None:
        use_pallas = n * np.dtype(dtype).itemsize >= _PALLAS_MIN_BYTES

    if use_pallas:
        return _normalize_pallas_impl(cond_encodeds, _get_scale_row(img_w, img_h, dtype))
    return _normalize_xla_impl(cond_encodeds, _get_scale_vec(img_w, img_h, dtype, D))


def generate(conditions, img_w, img_h, interval, use_pallas=None):
    """Mirror of BasePositionPredictor.generate():
    - pad each ragged condition sequence to `interval` rows (repeat last row)
    - stack into [B, interval, D]  (single host-side NumPy pad, one upload)
    - normalize even cols by img_w, odd cols by img_h (Pallas / fused XLA)
    """
    B = len(conditions)
    if B == 0:
        return jnp.zeros((0, interval, 0), dtype=jnp.float32)
    D = int(np.asarray(conditions[0]).shape[-1])
    batch = np.empty((B, interval, D), dtype=np.float32)
    for i, c in enumerate(conditions):
        c = np.asarray(c, dtype=np.float32)
        m = c.shape[0]
        batch[i, :m] = c
        if m < interval:
            batch[i, m:] = c[-1]
    cond_encodeds = jnp.asarray(batch)  # single contiguous H2D upload

    normalized = normalize_conditions(cond_encodeds, img_w, img_h, use_pallas=use_pallas)

    # TODO(synk): self.forward(cond_encodeds) is abstract (NotImplementedError) in
    # BasePositionPredictor; subclasses define it, so we return the normalized
    # conditions (the concrete compute of this base class).
    return normalized


if __name__ == "__main__":
    key = jax.random.PRNGKey(0)
    interval = 8   # config['interval']
    D = 4          # (x, y, w, h)-style box features
    img_w, img_h = 640.0, 480.0

    # Two ragged condition sequences (lengths 5 and 8) -> padded to interval=8.
    k1, k2 = jax.random.split(key)
    cond0 = np.asarray(jax.random.uniform(k1, (5, D), minval=0.0, maxval=500.0))
    cond1 = np.asarray(jax.random.uniform(k2, (interval, D), minval=0.0, maxval=500.0))
    conditions = [cond0, cond1]

    # Force the Pallas path so the kernel is exercised even at this tiny size.
    out_pallas = generate(conditions, img_w, img_h, interval, use_pallas=True)
    out_pallas = jax.block_until_ready(out_pallas)

    # Auto path (routes tiny inputs to the fused XLA fallback).
    out_auto = generate(conditions, img_w, img_h, interval)
    out_auto = jax.block_until_ready(out_auto)

    # Reference check (plain numpy, same semantics as the torch code).
    ref_list = []
    for c in conditions:
        c = np.asarray(c, dtype=np.float32)
        if c.shape[0] != interval:
            c = np.concatenate(
                [c, np.repeat(c[-1:], interval - c.shape[0], axis=0)], axis=0
            )
        ref_list.append(c[None])
    ref = np.concatenate(ref_list, axis=0)
    ref[:, :, 0::2] = ref[:, :, 0::2] / img_w
    ref[:, :, 1::2] = ref[:, :, 1::2] / img_h

    # rtol loosened slightly: kernel multiplies by precomputed reciprocal (~1 ulp).
    np.testing.assert_allclose(np.asarray(out_pallas), ref, rtol=1e-5, atol=1e-6)
    np.testing.assert_allclose(np.asarray(out_auto), ref, rtol=1e-5, atol=1e-6)
    print("KERNEL_OK")
</pallas_src>

<mosaic_0001>
module attributes {stable_mosaic.version = 11 : i64} {
  func.func @_scale_kernel(%arg0: i32, %arg1: memref<1x128xf32, #tpu.memory_space<vmem>>, %arg2: memref<8x128xf32, #tpu.memory_space<vmem>>, %arg3: memref<8x128xf32, #tpu.memory_space<vmem>>) attributes {dimension_semantics = [#tpu.dimension_semantics<parallel>], iteration_bounds = array<i64: 1>, scalar_prefetch = 0 : i64, scratch_operands = 0 : i64, tpu.core_type = #tpu.core_type<tc>, window_params = [{pipeline_mode = #tpu.pipeline_mode<synchronous>, transform_indices = @transform_0, window_bounds = array<i64: 1, 128>}, {transform_indices = @transform_1, window_bounds = array<i64: 8, 128>}, {transform_indices = @transform_2, window_bounds = array<i64: 8, 128>}]} {
    %c0 = arith.constant 0 : index
    %c0_0 = arith.constant 0 : index
    %0 = vector.load %arg2[%c0, %c0_0] : memref<8x128xf32, #tpu.memory_space<vmem>>, vector<8x128xf32>
    %c0_1 = arith.constant 0 : index
    %c0_2 = arith.constant 0 : index
    %1 = vector.load %arg1[%c0_1, %c0_2] : memref<1x128xf32, #tpu.memory_space<vmem>>, vector<1x128xf32>
    %2 = vector.broadcast %1 : vector<1x128xf32> to vector<8x128xf32>
    %3 = arith.mulf %0, %2 : vector<8x128xf32>
    %c0_3 = arith.constant 0 : index
    %c0_4 = arith.constant 0 : index
    %4 = vector.load %arg3[%c0_3, %c0_4] : memref<8x128xf32, #tpu.memory_space<vmem>>, vector<8x128xf32>
    tpu.vector_store %arg3[%c0_3, %c0_4], %3 {strides = array<i32>} : memref<8x128xf32, #tpu.memory_space<vmem>>, vector<8x128xf32>,
    return
  }
  func.func @transform_0(%arg0: i32) -> (i32, i32) {
    %c0_i32 = arith.constant 0 : i32
    %c0_i32_0 = arith.constant 0 : i32
    %c0_i32_1 = arith.constant 0 : i32
    return %c0_i32, %c0_i32_0 : i32, i32
  }
  func.func @transform_1(%arg0: i32) -> (i32, i32) {
    %c0_i32 = arith.constant 0 : i32
    %c0_i32_0 = arith.constant 0 : i32
    return %arg0, %c0_i32 : i32, i32
  }
  func.func @transform_2(%arg0: i32) -> (i32, i32) {
    %c0_i32 = arith.constant 0 : i32
    %c0_i32_0 = arith.constant 0 : i32
    return %arg0, %c0_i32 : i32, i32
  }
}

</mosaic_0001>

<bundles_post_ra>
// kernel: _normalize_pallas_impl.1
= control target key start
LH: loop header
LB: loop body
LE: loop exit
PB: predicated region body
PF: predicated region fallthrough
CT: control target
= control target key end

     0   :  { %s50_s0 = inlined_call_operand.vmem [shape: f32[1,128], index: 0, kind: input, shape index: {}]   ;;  %s51_s1 = inlined_call_operand.vmem [shape: f32[8,128], index: 1, kind: input, shape index: {}]   ;;  %s52_s2 = inlined_call_operand.vmem [shape: f32[8,128], index: 2, kind: output, shape index: {}]  }
   0x1   :  { %v11_v0 = vld [vmem:[%s51_s1] sm:$0xff] }
   0x2   :  { %v25_v1 = vld [vmem:[%s50_s0] ss:$0 sm:$0xff] }
   0x3   :  { %v19_v2 = vmul.f32 %v25_v1, %v11_v0 }
   0x5   :  { %20 = vst [vmem:[%s52_s2] sm:$0xff] %v19_v2 }

</bundles_post_ra>
